<compile_context>
chip_gen: v7x
topology: tpu7x:2x2x1
jax: 0.10.0
libtpu: 0.0.40
codegen_flags: <defaults>
</compile_context>

<pallas_src>
import functools
import math

import jax
import jax.numpy as jnp
from jax.experimental import pallas as pl
from jax.experimental.pallas import tpu as pltpu


# -----------------------------------------------------------------------------
# helpers
# -----------------------------------------------------------------------------
def _sublane_align(dtype) -> int:
    """Minimum second-to-last block-dim alignment for a dtype (f32->8, bf16->16)."""
    return max(8, 32 // jnp.dtype(dtype).itemsize)


def _choose_tile(dim: int, preferred: int, align: int) -> int:
    """Largest multiple of `align` that divides `dim` and is <= `preferred`.
    Falls back to the full dimension (always a legal block size)."""
    if dim <= preferred:
        return dim
    t = (preferred // align) * align
    while t >= align:
        if dim % t == 0:
            return t
        t -= align
    return dim


@functools.lru_cache(maxsize=1)
def _vmem_limit_bytes() -> int:
    """Generation-aware VMEM limit: ~85% of physical, capped at ~110 MiB.
    (v7x: ~54 MiB of 64; v5e/v6e: ~108 MiB of 128). Safe fallback 48 MiB."""
    try:
        info = pltpu.get_tpu_info()
        cap = getattr(info, "vmem_capacity_bytes", None)
        if not cap:
            cap = getattr(info, "vmem_bytes", None)
        if cap:
            return int(min(cap * 0.85, 110 * 1024 * 1024))
    except Exception:
        pass
    return 48 * 1024 * 1024


# -----------------------------------------------------------------------------
# tiled linear:  y = x @ W + b   (f32 accumulator, K innermost)
# -----------------------------------------------------------------------------
def _linear_kernel(x_ref, w_ref, b_ref, o_ref, acc_ref):
    k = pl.program_id(2)

    @pl.when(k == 0)
    def _():
        acc_ref[...] = jnp.zeros_like(acc_ref)

    acc_ref[...] += jnp.dot(x_ref[...], w_ref[...],
                            preferred_element_type=jnp.float32)

    @pl.when(k == pl.num_programs(2) - 1)
    def _():
        o_ref[...] = (acc_ref[...] + b_ref[...]).astype(o_ref.dtype)


def _linear(x2d, w, b, *, out_dtype=None, tm=512, tn=512, tk=512):
    M, K = x2d.shape
    _, N = w.shape
    out_dtype = x2d.dtype if out_dtype is None else out_dtype
    m_align = max(_sublane_align(x2d.dtype), _sublane_align(out_dtype))
    tm = _choose_tile(M, tm, m_align)
    tn = _choose_tile(N, tn, 128)
    tk = _choose_tile(K, tk, 128)
    b2 = b.reshape(1, N).astype(jnp.float32)   # bias added to f32 accumulator

    return pl.pallas_call(
        _linear_kernel,
        out_shape=jax.ShapeDtypeStruct((M, N), out_dtype),
        grid_spec=pltpu.PrefetchScalarGridSpec(
            num_scalar_prefetch=0,
            grid=(M // tm, N // tn, K // tk),
            in_specs=[
                pl.BlockSpec((tm, tk), lambda i, j, k: (i, k)),
                pl.BlockSpec((tk, tn), lambda i, j, k: (k, j)),
                pl.BlockSpec((1, tn), lambda i, j, k: (0, j)),
            ],
            out_specs=pl.BlockSpec((tm, tn), lambda i, j, k: (i, j)),
            scratch_shapes=[pltpu.VMEM((tm, tn), jnp.float32)],
        ),
        compiler_params=pltpu.CompilerParams(
            dimension_semantics=("parallel", "parallel", "arbitrary"),
            vmem_limit_bytes=_vmem_limit_bytes()),
    )(x2d, w, b2)


# -----------------------------------------------------------------------------
# flash attention kernel (online softmax over KV tiles)
# -----------------------------------------------------------------------------
def _flash_attn_kernel(q_ref, k_ref, v_ref, o_ref,
                       q_scr, m_scr, l_scr, acc_scr,
                       *, causal, tq, tk, sm_scale, approx_recip):
    qi = pl.program_id(1)
    kv = pl.program_id(2)

    @pl.when(kv == 0)
    def _():
        # Fold 1/sqrt(d_head) into q once per (bh, qi) instead of per KV step.
        q_scr[...] = (q_ref[0] * sm_scale).astype(q_scr.dtype)
        m_scr[...] = jnp.full_like(m_scr, -1e30)   # finite, avoids -inf - -inf
        l_scr[...] = jnp.zeros_like(l_scr)
        acc_scr[...] = jnp.zeros_like(acc_scr)

    def _update(apply_mask):
        q = q_scr[...]                                            # (tq, dh)
        k = k_ref[0]                                              # (tk, dh)
        # s[a, b] = sum_d q[a, d] * k[b, d]
        s = jax.lax.dot_general(q, k, (((1,), (1,)), ((), ())),
                                preferred_element_type=jnp.float32)  # (tq, tk)
        if apply_mask:
            row = qi * tq + jax.lax.broadcasted_iota(jnp.int32, (tq, tk), 0)
            col = kv * tk + jax.lax.broadcasted_iota(jnp.int32, (tq, tk), 1)
            s = jnp.where(col > row, -1e30, s)

        m_prev = m_scr[...]                                       # (tq, 1)
        m_new = jnp.maximum(m_prev, jnp.max(s, axis=-1, keepdims=True))
        alpha = jnp.exp(m_prev - m_new)                           # (tq, 1) f32
        p = jnp.exp(s - m_new)                                    # (tq, tk) f32
        l_scr[...] = alpha * l_scr[...] + jnp.sum(p, axis=-1, keepdims=True)
        pv = jnp.dot(p.astype(v_ref.dtype), v_ref[0],
                     preferred_element_type=jnp.float32)          # (tq, dh)
        acc_scr[...] = alpha * acc_scr[...] + pv
        m_scr[...] = m_new

    if causal:
        q_start = qi * tq
        kv_start = kv * tk
        needed = kv_start < q_start + tq          # tile visible to some query
        crosses = kv_start + tk > q_start + 1     # tile crosses the diagonal

        @pl.when(needed & crosses)
        def _():
            _update(apply_mask=True)

        @pl.when(needed & jnp.logical_not(crosses))
        def _():
            _update(apply_mask=False)
    else:
        _update(apply_mask=False)

    @pl.when(kv == pl.num_programs(2) - 1)
    def _():
        inv_l = pl.reciprocal(l_scr[...], approx=approx_recip)    # EUP slot
        o_ref[0] = (acc_scr[...] * inv_l).astype(o_ref.dtype)


# -----------------------------------------------------------------------------
# full module forward
# -----------------------------------------------------------------------------
def flash_self_attention(x, w_in, b_in, w_out, b_out, *, n_heads,
                         causal_mask=False, q_tile=512, kv_tile=256,
                         compute_dtype=jnp.bfloat16):
    """x: (B, S, D).  w_in: (D, 3D), b_in: (3D,), w_out: (D, D), b_out: (D,).
    Weights stored transposed relative to torch.nn.Linear (y = x @ W + b)."""
    B, S, D = x.shape
    H = n_heads
    assert D % H == 0
    dh = D // H
    cdt = jnp.dtype(compute_dtype)
    approx_recip = cdt != jnp.dtype(jnp.float32)

    # Cast params / activations once in the wrapper; all kernels stream cdt.
    x_c = x.reshape(B * S, D).astype(cdt)
    w_in_c = w_in.astype(cdt)
    w_out_c = w_out.astype(cdt)

    # ---- in_proj (tiled GEMM kernel, cdt output in HBM) ----------------------
    qkv = _linear(x_c, w_in_c, b_in, out_dtype=cdt)

    # ---- head split: single relayout pass, NO dh->128 padding in HBM --------
    # (B, S, 3, H, dh) -> (3, B, H, S, dh): matches torch chunk(3) + head split.
    qkv = qkv.reshape(B, S, 3, H, dh).transpose(2, 0, 3, 1, 4)
    qkv = qkv.reshape(3, B * H, S, dh)
    q, k, v = qkv[0], qkv[1], qkv[2]                              # (B*H, S, dh)

    # ---- flash attention ------------------------------------------------------
    align = _sublane_align(cdt)
    tq = _choose_tile(S, q_tile, align)
    tk = _choose_tile(S, kv_tile, align)

    kernel = functools.partial(
        _flash_attn_kernel, causal=causal_mask, tq=tq, tk=tk,
        sm_scale=1.0 / math.sqrt(dh), approx_recip=approx_recip)

    q_map = lambda bh, qi, kv: (bh, qi, 0)
    if causal_mask:
        # Clamp to the last needed KV tile: fully-masked tiles keep the same
        # block index, so Pallas issues no DMA for them.
        def kv_map(bh, qi, kv):
            return (bh, jnp.minimum(kv, (qi * tq + tq - 1) // tk), 0)
    else:
        def kv_map(bh, qi, kv):
            return (bh, kv, 0)

    ctx = pl.pallas_call(
        kernel,
        out_shape=jax.ShapeDtypeStruct((B * H, S, dh), cdt),
        grid_spec=pltpu.PrefetchScalarGridSpec(
            num_scalar_prefetch=0,
            grid=(B * H, S // tq, S // tk),
            in_specs=[
                pl.BlockSpec((1, tq, dh), q_map),
                pl.BlockSpec((1, tk, dh), kv_map),
                pl.BlockSpec((1, tk, dh), kv_map),
            ],
            out_specs=pl.BlockSpec((1, tq, dh), q_map),
            scratch_shapes=[
                pltpu.VMEM((tq, dh), cdt),             # scaled, cast q tile
                pltpu.VMEM((tq, 1), jnp.float32),      # running max  m
                pltpu.VMEM((tq, 1), jnp.float32),      # running sum  l
                pltpu.VMEM((tq, dh), jnp.float32),     # output accumulator
            ],
        ),
        compiler_params=pltpu.CompilerParams(
            dimension_semantics=("parallel", "parallel", "arbitrary"),
            vmem_limit_bytes=_vmem_limit_bytes()),
    )(q, k, v)

    # ---- merge heads + out_proj (final output back in x.dtype) ---------------
    ctx = ctx.reshape(B, H, S, dh).transpose(0, 2, 1, 3).reshape(B * S, D)
    out = _linear(ctx, w_out_c, b_out, out_dtype=x.dtype)
    return out.reshape(B, S, D)


# -----------------------------------------------------------------------------
# pure-JAX reference (matches the PyTorch module's standard-attention path)
# -----------------------------------------------------------------------------
def _reference(x, w_in, b_in, w_out, b_out, n_heads, causal_mask):
    B, S, D = x.shape
    dh = D // n_heads
    hp = jax.lax.Precision.HIGHEST
    qkv = jnp.einsum('bsd,de->bse', x, w_in, precision=hp) + b_in
    q, k, v = jnp.split(qkv, 3, axis=-1)
    q = q.reshape(B, S, n_heads, dh).transpose(0, 2, 1, 3)
    k = k.reshape(B, S, n_heads, dh).transpose(0, 2, 1, 3)
    v = v.reshape(B, S, n_heads, dh).transpose(0, 2, 1, 3)
    scores = jnp.einsum('bhqd,bhkd->bhqk', q, k, precision=hp) / math.sqrt(dh)
    if causal_mask:
        mask = jnp.triu(jnp.ones((S, S), dtype=bool), 1)
        scores = jnp.where(mask[None, None], -jnp.inf, scores)
    probs = jax.nn.softmax(scores, axis=-1)
    out = jnp.einsum('bhqk,bhkd->bhqd', probs, v, precision=hp)
    out = out.transpose(0, 2, 1, 3).reshape(B, S, D)
    return jnp.einsum('bsd,de->bse', out, w_out, precision=hp) + b_out


# -----------------------------------------------------------------------------
# self-test
# -----------------------------------------------------------------------------
def _run_case(B, S, D, H, causal, compute_dtype, atol, rtol, *,
              q_tile=512, kv_tile=256):
    key = jax.random.PRNGKey(0)
    kx, k1, k2, k3, k4 = jax.random.split(key, 5)
    bound = 1.0 / math.sqrt(D)
    x = jax.random.normal(kx, (B, S, D), dtype=jnp.float32)
    w_in = jax.random.uniform(k1, (D, 3 * D), jnp.float32, -bound, bound)
    b_in = jax.random.uniform(k2, (3 * D,), jnp.float32, -bound, bound)
    w_out = jax.random.uniform(k3, (D, D), jnp.float32, -bound, bound)
    b_out = jax.random.uniform(k4, (D,), jnp.float32, -bound, bound)

    ref = _reference(x, w_in, b_in, w_out, b_out, H, causal)
    out = flash_self_attention(x, w_in, b_in, w_out, b_out, n_heads=H,
                               causal_mask=causal, q_tile=q_tile,
                               kv_tile=kv_tile, compute_dtype=compute_dtype)
    out = jax.block_until_ready(out)
    assert out.shape == (B, S, D)
    assert jnp.allclose(out, ref, atol=atol, rtol=rtol), (
        f"mismatch: B={B} S={S} D={D} H={H} causal={causal} "
        f"dtype={jnp.dtype(compute_dtype).name} "
        f"max_err={float(jnp.max(jnp.abs(out - ref)))}")


if __name__ == "__main__":
    # Small shapes implied by the module (single-tile fallback paths).
    for causal in (False, True):
        _run_case(2, 8, 32, 4, causal, jnp.float32, atol=1e-2, rtol=1e-2)
        _run_case(2, 8, 32, 4, causal, jnp.bfloat16, atol=5e-2, rtol=5e-2)

    # Multi-tile paths: dh=64 (no HBM pad), several q/kv tiles, causal clamp.
    _run_case(2, 256, 128, 2, True, jnp.float32, atol=1e-2, rtol=1e-2,
              q_tile=128, kv_tile=64)
    _run_case(2, 256, 128, 2, False, jnp.bfloat16, atol=5e-2, rtol=5e-2,
              q_tile=128, kv_tile=64)

    print("KERNEL_OK")
</pallas_src>

<mosaic_0001>
module attributes {stable_mosaic.version = 11 : i64} {
  func.func @_linear_kernel(%arg0: i32, %arg1: i32, %arg2: i32, %arg3: memref<16x32xf32, #tpu.memory_space<vmem>>, %arg4: memref<32x96xf32, #tpu.memory_space<vmem>>, %arg5: memref<1x96xf32, #tpu.memory_space<vmem>>, %arg6: memref<16x96xf32, #tpu.memory_space<vmem>>, %arg7: memref<16x96xf32, #tpu.memory_space<vmem>>) attributes {dimension_semantics = [#tpu.dimension_semantics<parallel>, #tpu.dimension_semantics<parallel>, #tpu.dimension_semantics<arbitrary>], iteration_bounds = array<i64: 1, 1, 1>, scalar_prefetch = 0 : i64, scratch_operands = 1 : i64, tpu.core_type = #tpu.core_type<tc>, window_params = [{transform_indices = @transform_0, window_bounds = array<i64: 16, 32>}, {transform_indices = @transform_1, window_bounds = array<i64: 32, 96>}, {transform_indices = @transform_2, window_bounds = array<i64: 1, 96>}, {transform_indices = @transform_3, window_bounds = array<i64: 16, 96>}]} {
    %c0_i32 = arith.constant 0 : i32
    %0 = arith.cmpi eq, %arg2, %c0_i32 : i32
    %1 = arith.extui %0 : i1 to i32
    %c0_i32_0 = arith.constant 0 : i32
    %2 = arith.cmpi ne, %1, %c0_i32_0 : i32
    scf.if %2 {
      %cst_10 = arith.constant 0.000000e+00 : f32
      %12 = vector.broadcast %cst_10 : f32 to vector<16x96xf32>
      %c0_11 = arith.constant 0 : index
      %c0_12 = arith.constant 0 : index
      %13 = vector.load %arg7[%c0_11, %c0_12] : memref<16x96xf32, #tpu.memory_space<vmem>>, vector<16x96xf32>
      tpu.vector_store %arg7[%c0_11, %c0_12], %12 {strides = array<i32>} : memref<16x96xf32, #tpu.memory_space<vmem>>, vector<16x96xf32>,
    } else {
    }
    %c0 = arith.constant 0 : index
    %c0_1 = arith.constant 0 : index
    %3 = vector.load %arg7[%c0, %c0_1] : memref<16x96xf32, #tpu.memory_space<vmem>>, vector<16x96xf32>
    %c0_2 = arith.constant 0 : index
    %c0_3 = arith.constant 0 : index
    %4 = vector.load %arg3[%c0_2, %c0_3] : memref<16x32xf32, #tpu.memory_space<vmem>>, vector<16x32xf32>
    %c0_4 = arith.constant 0 : index
    %c0_5 = arith.constant 0 : index
    %5 = vector.load %arg4[%c0_4, %c0_5] : memref<32x96xf32, #tpu.memory_space<vmem>>, vector<32x96xf32>
    %cst = arith.constant dense<0.000000e+00> : vector<16x96xf32>
    %6 = tpu.matmul %4, %5, %cst {dimension_numbers = #tpu.dot_dimension_numbers<[1], [0], [0], [1], [0, 0, 1, 1], [], []>} : vector<16x32xf32>, vector<32x96xf32>, vector<16x96xf32> -> vector<16x96xf32>
    %7 = arith.addf %3, %6 : vector<16x96xf32>
    %c0_6 = arith.constant 0 : index
    %c0_7 = arith.constant 0 : index
    %8 = vector.load %arg7[%c0_6, %c0_7] : memref<16x96xf32, #tpu.memory_space<vmem>>, vector<16x96xf32>
    tpu.vector_store %arg7[%c0_6, %c0_7], %7 {strides = array<i32>} : memref<16x96xf32, #tpu.memory_space<vmem>>, vector<16x96xf32>,
    %c0_i32_8 = arith.constant 0 : i32
    %9 = arith.cmpi eq, %arg2, %c0_i32_8 : i32
    %10 = arith.extui %9 : i1 to i32
    %c0_i32_9 = arith.constant 0 : i32
    %11 = arith.cmpi ne, %10, %c0_i32_9 : i32
    scf.if %11 {
      %c0_10 = arith.constant 0 : index
      %c0_11 = arith.constant 0 : index
      %12 = vector.load %arg7[%c0_10, %c0_11] : memref<16x96xf32, #tpu.memory_space<vmem>>, vector<16x96xf32>
      %c0_12 = arith.constant 0 : index
      %c0_13 = arith.constant 0 : index
      %13 = vector.load %arg5[%c0_12, %c0_13] : memref<1x96xf32, #tpu.memory_space<vmem>>, vector<1x96xf32>
      %14 = vector.broadcast %13 : vector<1x96xf32> to vector<16x96xf32>
      %15 = arith.addf %12, %14 : vector<16x96xf32>
      %c0_14 = arith.constant 0 : index
      %c0_15 = arith.constant 0 : index
      %16 = vector.load %arg6[%c0_14, %c0_15] : memref<16x96xf32, #tpu.memory_space<vmem>>, vector<16x96xf32>
      tpu.vector_store %arg6[%c0_14, %c0_15], %15 {strides = array<i32>} : memref<16x96xf32, #tpu.memory_space<vmem>>, vector<16x96xf32>,
    } else {
    }
    return
  }
  func.func @transform_0(%arg0: i32, %arg1: i32, %arg2: i32) -> (i32, i32) {
    %c0_i32 = arith.constant 0 : i32
    return %arg0, %arg2 : i32, i32
  }
  func.func @transform_1(%arg0: i32, %arg1: i32, %arg2: i32) -> (i32, i32) {
    %c0_i32 = arith.constant 0 : i32
    return %arg2, %arg1 : i32, i32
  }
  func.func @transform_2(%arg0: i32, %arg1: i32, %arg2: i32) -> (i32, i32) {
    %c0_i32 = arith.constant 0 : i32
    %c0_i32_0 = arith.constant 0 : i32
    return %c0_i32, %arg1 : i32, i32
  }
  func.func @transform_3(%arg0: i32, %arg1: i32, %arg2: i32) -> (i32, i32) {
    %c0_i32 = arith.constant 0 : i32
    return %arg0, %arg1 : i32, i32
  }
}

</mosaic_0001>

<bundles_post_ra>
// kernel: tpu_custom_call.1
= control target key start
LH: loop header
LB: loop body
LE: loop exit
PB: predicated region body
PF: predicated region fallthrough
CT: control target
= control target key end

     0   :  { %8 = vsyncpa [#allocation4], 0  ;;  %s365_s0 = inlined_call_operand.hbm [shape: f32[16,32], index: 0, kind: input, shape index: {}]   ;;  %s366_s1 = inlined_call_operand.hbm [shape: f32[32,96], index: 1, kind: input, shape index: {}]   ;;  %s367_s2 = inlined_call_operand.vmem [shape: f32[1,96], index: 2, kind: input, shape index: {}]   ;;  %s368_s3 = inlined_call_operand.hbm [shape: f32[16,96], index: 3, kind: output, shape index: {}]  }
   0x1   :  { %9 = vsyncpa [#allocation7], 0 }
   0x2   :  { %10 = vsyncpa [#allocation5], 0  ;;  %s285_s12 = smov [#allocation3]   ;;  %s213_s16 = scalar_lea.hbm %s365_s0, 256 }
   0x3   :  { %s16_s13 = sshll.u32 %s285_s12, 4  ;;  %p214_p0 = scmp.ne.s32.totalorder %s365_s0, %s213_s16  ;;  %s17_s13 = int_to_ptr.vmem [resolvable:$true] %s16_s13 }
   0x4   :  { %p217_p1 = scmp.lt.u32.totalorder %s213_s16, %s365_s0 }
   0x6   :  { %p219_p2 = pnand %p217_p1, %p214_p0 }
   0x8   :  { %222 = shalt.err (!%p219_p2)
}
   0x9   :  { %s223_s21 = scalar_lea.vmem %s17_s13, 256  ;;  %p228_p4 = scmp.lt.s32.totalorder %s17_s13, %s17_s13 }
   0xa   :  { %p224_p3 = scmp.ne.s32.totalorder %s17_s13, %s223_s21  ;;  %p229_p5 = scmp.lt.s32.totalorder %s223_s21, %s223_s21 }
   0xc   :  { %p230_p6 = por %p229_p5, %p228_p4 }
   0xe   :  { %p231_p7 = pnand %p230_p6, %p224_p3 }
  0x10   :  { %234 = shalt.err (!%p231_p7)
}
  0x11   :  { %s286_s22 = smov 128   ;;  %s287_s23 = smov 8  }
  0x12   :  { %22 = dma.hbm_to_vmem [thread:$0]  %s365_s0, 256, %s17_s13, [#allocation4], %s286_s22, %s286_s22, %s287_s23  }
  0x13   :  { %s288_s26 = smov [#allocation6]   ;;  %s235_s30 = scalar_lea.hbm %s366_s1, 512 }
  0x14   :  { %s28_s27 = sshll.u32 %s288_s26, 4  ;;  %p236_p8 = scmp.ne.s32.totalorder %s366_s1, %s235_s30  ;;  %s29_s27 = int_to_ptr.vmem [resolvable:$true] %s28_s27 }
  0x15   :  { %p239_p9 = scmp.lt.u32.totalorder %s235_s30, %s366_s1 }
  0x17   :  { %p241_p10 = pnand %p239_p9, %p236_p8 }
  0x19   :  { %244 = shalt.err (!%p241_p10)
}
  0x1a   :  { %s245_s8 = scalar_lea.vmem %s29_s27, 512  ;;  %p250_p12 = scmp.lt.s32.totalorder %s29_s27, %s29_s27 }
  0x1b   :  { %p246_p11 = scmp.ne.s32.totalorder %s29_s27, %s245_s8  ;;  %p251_p13 = scmp.lt.s32.totalorder %s245_s8, %s245_s8 }
  0x1d   :  { %p252_p0 = por %p251_p13, %p250_p12 }
  0x1f   :  { %p253_p1 = pnand %p252_p0, %p246_p11 }
  0x21   :  { %256 = shalt.err (!%p253_p1)
}
  0x22   :  { %34 = dma.hbm_to_vmem [thread:$0]  %s366_s1, 512, %s29_s27, [#allocation7], %s286_s22, %s286_s22, %s287_s23  }
  0x23   :  { %279 = dma.done.wait [#allocation4], 256  }
  0x24   :  { %280 = vsyncadd [#allocation4], 4294967040 }
  0x25   :  { %281 = dma.done.wait [#allocation7], 512  }
  0x26   :  { %282 = vsyncadd [#allocation7], 4294966784  ;;  %vm47_vm0 = vcmask 785408   ;;  %v289_v0 = vmov 0.0   ;;  %vm58_vm1 = vcmask 261120   ;;  %v54_v1 = vld [vmem:[#allocation6] sm:$0xff] }
  0x27   :  { %49 = vst.msk [vmem:[#allocation2 + $0x8] sm:$0xff] %vm47_vm0, %v289_v0  ;;  %48 = vst.msk [vmem:[#allocation2] sm:$0xff] %vm47_vm0, %v289_v0  ;;  %v55_v2 = vld [vmem:[#allocation6 + $0x8] sm:$0xff]  ;;  %v56_v3 = vld [vmem:[#allocation6 + $0x10] sm:$0xff]  ;;  %s290_s11 = smov [#allocation8]  }
  0x28   :  { %v199_v4 = vpack.c.bf16 %v55_v2, %v54_v1  ;;  %v57_v5 = vld [vmem:[#allocation6 + $0x18] sm:$0xff]  ;;  %v52_v6 = vld [vmem:[#allocation3] sm:$0xff]  ;;  %v181_v15 = vld [vmem:[%s367_s2] ss:$0 sm:$0xff]  ;;  %s166_s12 = sshll.u32 %s290_s11, 4  ;;  %s167_s12 = int_to_ptr.vmem [resolvable:$true] %s166_s12 }
  0x29   :  { %v203_v7 = vpack.c.bf16 %v57_v5, %v56_v3  ;;  %196 = vmatprep.mubr.msk.f32.mxu0 %vm58_vm1, %v52_v6  ;;  %v53_v8 = vld [vmem:[#allocation3 + $0x8] sm:$0xff]  ;;  %s257_s13 = scalar_lea.vmem %s167_s12, 256  ;;  %p262_p3 = scmp.lt.s32.totalorder %s167_s12, %s167_s12 }
  0x2a   :  { %200 = vmatprep.subr.bf16.mxu0 %v199_v4  ;;  %p258_p2 = scmp.ne.s32.totalorder %s167_s12, %s257_s13  ;;  %p263_p4 = scmp.lt.s32.totalorder %s257_s13, %s257_s13 }
  0x2b   :  { %202 = vmatpush3.bf16.msra.mxu0 %v199_v4 }
  0x2c   :  { %204 = vmatprep.subr.bf16.mxu0 %v203_v7  ;;  %p264_p5 = por %p263_p4, %p262_p3 }
  0x2e   :  { %v51_v9 = vld [vmem:[#allocation2 + $0x8] sm:$0xff]  ;;  %v50_v10 = vld [vmem:[#allocation2] sm:$0xff]  ;;  %p265_p6 = pnand %p264_p5, %p258_p2 }
  0x2f   :  { %206 = vmatpush3.bf16.msra.mxu0 %v203_v7 }
  0x32   :  { %197 = vmatmul.mubr.msk.f32.vlgmr.msra.gmra.mrb[0].mxu0 %vm58_vm1, %v53_v8 }
 0x105   :  { %v198_v11 = vpop.f32.mrb[0].mxu0 }
 0x106   :  { %v141_v12 = vadd.f32 %v198_v11, %v51_v9  ;;  %v131_v13 = vpop.f32.mrb[1].mxu0 }
 0x107   :  { %v140_v14 = vadd.f32 %v131_v13, %v50_v10 }
 0x108   :  { %144 = vst.msk [vmem:[#allocation2 + $0x8] sm:$0xff] %vm47_vm0, %v141_v12 }
 0x109   :  { %143 = vst.msk [vmem:[#allocation2] sm:$0xff] %vm47_vm0, %v140_v14 }
 0x10f   :  { %v149_v16 = vld [vmem:[#allocation2 + $0x8] sm:$0xff] }
 0x110   :  { %v148_v17 = vld [vmem:[#allocation2] sm:$0xff]  ;;  %v158_v18 = vadd.f32 %v181_v15, %v149_v16 }
 0x111   :  { %v157_v19 = vadd.f32 %v181_v15, %v148_v17 }
 0x112   :  { %160 = vst.msk [vmem:[#allocation8 + $0x8] sm:$0xff] %vm47_vm0, %v158_v18 }
 0x113   :  { %159 = vst.msk [vmem:[#allocation8] sm:$0xff] %vm47_vm0, %v157_v19 }
 0x114   :  { %268 = shalt.err (!%p265_p6)
}
 0x115   :  { %s269_s15 = scalar_lea.hbm %s368_s3, 256 }
 0x116   :  { %p270_p7 = scmp.ne.s32.totalorder %s368_s3, %s269_s15  ;;  %p273_p8 = scmp.lt.u32.totalorder %s269_s15, %s368_s3 }
 0x118   :  { %p275_p9 = pnand %p273_p8, %p270_p7 }
 0x11a   :  { %278 = shalt.err (!%p275_p9)
}
 0x11b   :  { %172 = dma.vmem_to_hbm [thread:$0]  %s167_s12, 256, %s368_s3, [#allocation5], %s286_s22, %s286_s22, %s287_s23  }
 0x11c   :  { %283 = dma.done.wait [#allocation5], 256  }
 0x11d   :  { %284 = vsyncadd [#allocation5], 4294967040 }
 0x11e   :  { %176 = vsyncpa [#allocation4], 1 }
 0x11f   :  { %177 = vsyncpa [#allocation7], 1 }
 0x120   :  { %178 = vsyncpa [#allocation5], 1 }

</bundles_post_ra>
